<compile_context>
chip_gen: v6e
topology: v6e:2x2x1
jax: 0.10.0
libtpu: 0.0.40
codegen_flags: <defaults>
</compile_context>

<pallas_src>
import jax
import jax.numpy as jnp
from jax.experimental import pallas as pl
from jax.experimental.pallas import tpu as pltpu

HIDDEN = 64
INPUT_DIM = 8
COND_DIM = 4
OUTPUT_DIM = 6
N_LAYERS = 2          # residual blocks
BATCH = 8
LANE = 128            # lane-dense padding width
BATCH_TILE_MAX = 2048  # rows per grid step for large batches


def mlp_kernel(x_ref, cond_ref, w_x_ref, w_c_ref, b_in_ref,
               w_hid_ref, b_hid_ref, w_out_ref, b_out_ref, out_ref):
    # x:     (tile, 8)  f32        cond: (tile, 4) f32
    # w_x:   (8, 128)   f32   lanes [64:128] = fw0_x, lanes [0:64] = 0
    # w_c:   (4, 128)   f32   lanes [0:64]   = gw0,   lanes [64:128] = 0
    # b_in:  (1, 128)   f32   lanes [0:64] = gb0, lanes [64:128] = fb0 + gb2@fw0_c
    # w_hid: (8, 64, 64) bf16  [gw1, gw2@fw0_c, r0w0, r0w1, r0w2, r1w0, r1w1, r1w2]
    # b_hid: (7, 1, 64)  f32   [gb1, r0b0, r0b1, r0b2, r1b0, r1b1, r1b2]
    # w_out: (64, 128)  bf16 zero-padded;  b_out: (1, 128) f32 zero-padded
    # out:   (tile, 128) bf16 (cols >= OUTPUT_DIM are zero)

    def mm(h, w):
        return jnp.dot(h, w, preferred_element_type=jnp.float32)

    def relu_bf16(v):
        # ReLU + bias stay f32 on the dot output (no bf16 VALU on v5e);
        # cast to bf16 only for the next MXU operand.
        return jnp.maximum(v, 0.0).astype(jnp.bfloat16)

    # ---- fused input matmul (128-wide N) ----
    #   pre[:, 0:64]   = cond @ gw0 + gb0                 (g_proj pre-activation)
    #   pre[:, 64:128] = x @ fw0_x + fb0 + gb2 @ fw0_c    (x contribution to h)
    pre = (mm(x_ref[...], w_x_ref[...])
           + mm(cond_ref[...], w_c_ref[...])
           + b_in_ref[...])

    # ---- g_proj (third linear folded into fw0_c on host) ----
    c1 = relu_bf16(pre[:, :HIDDEN])
    c2 = relu_bf16(mm(c1, w_hid_ref[0]) + b_hid_ref[0])

    # ---- h = ReLU(cat([x, g_proj(cond)]) @ W0 + b0), with gw2/gb2 folded ----
    h_f32 = jnp.maximum(pre[:, HIDDEN:] + mm(c2, w_hid_ref[1]), 0.0)
    h_bf16 = h_f32.astype(jnp.bfloat16)

    # ---- residual blocks (running h kept in f32) ----
    wi, bi = 2, 1
    for _ in range(N_LAYERS):
        t = relu_bf16(mm(h_bf16, w_hid_ref[wi]) + b_hid_ref[bi])
        t = relu_bf16(mm(t, w_hid_ref[wi + 1]) + b_hid_ref[bi + 1])
        t = mm(t, w_hid_ref[wi + 2]) + b_hid_ref[bi + 2]      # f32
        h_f32 = h_f32 + t                                      # residual add in f32
        h_bf16 = h_f32.astype(jnp.bfloat16)
        wi += 3
        bi += 3

    # ---- output linear, lane-dense padded to 128; store as bf16 ----
    out_ref[...] = (mm(h_bf16, w_out_ref[...]) + b_out_ref[...]).astype(out_ref.dtype)


def make_params(key):
    """Deterministic init mirroring PyTorch layout.  Weights [in, out], biases [1, out]."""
    def lin(k, fan_in, fan_out):
        kw, kb = jax.random.split(k)
        w = jax.random.normal(kw, (fan_in, fan_out), jnp.float32) * 0.1
        b = jax.random.normal(kb, (1, fan_out), jnp.float32) * 0.1
        return w, b

    keys = jax.random.split(key, 16)
    ki = iter(keys)

    params = []
    # g_proj: cond_dim->64, 64->64, 64->64
    for fi, fo in [(COND_DIM, HIDDEN), (HIDDEN, HIDDEN), (HIDDEN, HIDDEN)]:
        params.extend(lin(next(ki), fi, fo))
    # first f linear: (input_dim + hidden) -> hidden, split into x / cond parts
    w_full, b_full = lin(next(ki), INPUT_DIM + HIDDEN, HIDDEN)
    params.extend([w_full[:INPUT_DIM, :], w_full[INPUT_DIM:, :], b_full])
    # residual blocks: 3 linears each, 64->64
    for _ in range(N_LAYERS):
        for _ in range(3):
            params.extend(lin(next(ki), HIDDEN, HIDDEN))
    # output linear: 64 -> output_dim
    params.extend(lin(next(ki), HIDDEN, OUTPUT_DIM))
    return params


def pack_params(params):
    """Pack per-layer params into a few lane-dense slabs, with the two
    review-requested fusions done once on host."""
    (gw0, gb0, gw1, gb1, gw2, gb2,
     fw0_x, fw0_c, fb0,
     r0w0, r0b0, r0w1, r0b1, r0w2, r0b2,
     r1w0, r1b0, r1w1, r1b1, r1w2, r1b2,
     wout, bout) = params

    # Fused 128-wide input weights (kept f32: tiny K, exact input path).
    w_x = jnp.zeros((INPUT_DIM, LANE), jnp.float32).at[:, HIDDEN:].set(fw0_x)
    w_c = jnp.zeros((COND_DIM, LANE), jnp.float32).at[:, :HIDDEN].set(gw0)

    # g_proj's last linear has no ReLU after it -> fold gw2/gb2 through fw0_c.
    w_cf = gw2 @ fw0_c                       # (64, 64)
    fb0_folded = fb0 + gb2 @ fw0_c           # (1, 64)

    b_in = jnp.zeros((1, LANE), jnp.float32)
    b_in = b_in.at[:, :HIDDEN].set(gb0)
    b_in = b_in.at[:, HIDDEN:].set(fb0_folded)

    w_hid = jnp.stack([gw1, w_cf,
                       r0w0, r0w1, r0w2,
                       r1w0, r1w1, r1w2]).astype(jnp.bfloat16)   # (8, 64, 64)
    b_hid = jnp.stack([gb1,
                       r0b0, r0b1, r0b2,
                       r1b0, r1b1, r1b2]).astype(jnp.float32)    # (7, 1, 64)

    w_out = (jnp.zeros((HIDDEN, LANE), jnp.float32)
             .at[:, :OUTPUT_DIM].set(wout).astype(jnp.bfloat16))  # (64, 128)
    b_out = jnp.zeros((1, LANE), jnp.float32).at[:, :OUTPUT_DIM].set(bout)

    return w_x, w_c, b_in, w_hid, b_hid, w_out, b_out


def _choose_tile(b):
    """Rows per grid step: big tiles amortize the ~0.35us/step overhead,
    but aim for >=2 programs so v7x can shard across its two TensorCores."""
    if b <= 16:
        return b                              # tiny batch: single tile
    tile = min(BATCH_TILE_MAX, pl.cdiv(b, 2))
    return ((tile + 7) // 8) * 8              # sublane-align


def mlp_forward(x, cond, packed, *, return_padded=False):
    w_x, w_c, b_in, w_hid, b_hid, w_out, b_out = packed
    b = x.shape[0]
    tile = _choose_tile(b)
    grid = (pl.cdiv(b, tile),)

    def resident(shape):
        nd = len(shape)
        return pl.BlockSpec(shape, lambda i, _n=nd: (0,) * _n)

    # Advisory cost hint for XLA scheduling around this call.
    flops = 2 * b * ((INPUT_DIM + COND_DIM) * LANE
                     + 8 * HIDDEN * HIDDEN + HIDDEN * LANE)
    bytes_accessed = (int(x.size) * 4 + int(cond.size) * 4 + b * LANE * 2
                      + sum(int(a.size) * a.dtype.itemsize for a in packed))

    out_padded = pl.pallas_call(
        mlp_kernel,
        out_shape=jax.ShapeDtypeStruct((b, LANE), jnp.bfloat16),
        grid_spec=pltpu.PrefetchScalarGridSpec(
            num_scalar_prefetch=0,
            grid=grid,
            in_specs=[
                pl.BlockSpec((tile, INPUT_DIM), lambda i: (i, 0)),  # x
                pl.BlockSpec((tile, COND_DIM), lambda i: (i, 0)),   # cond
                resident(w_x.shape),                                # weights resident
                resident(w_c.shape),
                resident(b_in.shape),
                resident(w_hid.shape),
                resident(b_hid.shape),
                resident(w_out.shape),
                resident(b_out.shape),
            ],
            out_specs=pl.BlockSpec((tile, LANE), lambda i: (i, 0)),
        ),
        compiler_params=pltpu.CompilerParams(
            dimension_semantics=("parallel",)),
        cost_estimate=pl.CostEstimate(
            flops=flops, transcendentals=0, bytes_accessed=bytes_accessed),
    )(x, cond, w_x, w_c, b_in, w_hid, b_hid, w_out, b_out)

    if return_padded:
        # Lane-dense (b, 128) bf16 slab; cols >= OUTPUT_DIM are zero.  Prefer
        # this for large batches and fuse the slice into the consumer.
        return out_padded
    return out_padded[:, :OUTPUT_DIM]


def mlp_reference(x, cond, params):
    """Pure-JAX f32 reference mirroring the PyTorch forward exactly."""
    (gw0, gb0, gw1, gb1, gw2, gb2,
     fw0_x, fw0_c, fb0,
     r0w0, r0b0, r0w1, r0b1, r0w2, r0b2,
     r1w0, r1b0, r1w1, r1b1, r1w2, r1b2,
     wout, bout) = params

    def relu(v):
        return jnp.maximum(v, 0.0)

    c = relu(cond @ gw0 + gb0)
    c = relu(c @ gw1 + gb1)
    c = c @ gw2 + gb2
    h = jnp.concatenate([x, c], axis=-1)
    w0 = jnp.concatenate([fw0_x, fw0_c], axis=0)
    h = relu(h @ w0 + fb0)
    for (wa, ba, wb, bb, wc, bc) in [
        (r0w0, r0b0, r0w1, r0b1, r0w2, r0b2),
        (r1w0, r1b0, r1w1, r1b1, r1w2, r1b2),
    ]:
        t = relu(h @ wa + ba)
        t = relu(t @ wb + bb)
        t = t @ wc + bc
        h = h + t
    return h @ wout + bout


if __name__ == "__main__":
    key = jax.random.PRNGKey(0)
    kx, kc, kp = jax.random.split(key, 3)
    params = make_params(kp)
    packed = pack_params(params)

    # --- small-batch check (single tile) ---
    x = jax.random.normal(kx, (BATCH, INPUT_DIM), jnp.float32)
    cond = jax.random.normal(kc, (BATCH, COND_DIM), jnp.float32)
    out = jax.block_until_ready(mlp_forward(x, cond, packed))
    ref = mlp_reference(x, cond, params)
    assert out.shape == (BATCH, OUTPUT_DIM)
    # bf16 matmul operands / bf16 output store with f32 accumulation.
    assert jnp.allclose(out.astype(jnp.float32), ref, atol=2e-2, rtol=2e-2), \
        "mismatch vs JAX reference (small batch)"

    # --- multi-tile check: grid of 2 programs with a partial last tile ---
    bl = 1000
    xl = jax.random.normal(jax.random.fold_in(kx, 1), (bl, INPUT_DIM), jnp.float32)
    cl = jax.random.normal(jax.random.fold_in(kc, 1), (bl, COND_DIM), jnp.float32)
    out_l = jax.block_until_ready(mlp_forward(xl, cl, packed))
    ref_l = mlp_reference(xl, cl, params)
    assert out_l.shape == (bl, OUTPUT_DIM)
    assert jnp.allclose(out_l.astype(jnp.float32), ref_l, atol=2e-2, rtol=2e-2), \
        "mismatch vs JAX reference (multi-tile batch)"

    print("KERNEL_OK")
</pallas_src>

<mosaic_0001>
module attributes {stable_mosaic.version = 11 : i64} {
  func.func @mlp_kernel(%arg0: i32, %arg1: memref<8x8xf32, #tpu.memory_space<vmem>>, %arg2: memref<8x4xf32, #tpu.memory_space<vmem>>, %arg3: memref<8x128xf32, #tpu.memory_space<vmem>>, %arg4: memref<4x128xf32, #tpu.memory_space<vmem>>, %arg5: memref<1x128xf32, #tpu.memory_space<vmem>>, %arg6: memref<8x64x64xbf16, #tpu.memory_space<vmem>>, %arg7: memref<7x1x64xf32, #tpu.memory_space<vmem>>, %arg8: memref<64x128xbf16, #tpu.memory_space<vmem>>, %arg9: memref<1x128xf32, #tpu.memory_space<vmem>>, %arg10: memref<8x128xbf16, #tpu.memory_space<vmem>>) attributes {dimension_semantics = [#tpu.dimension_semantics<parallel>], iteration_bounds = array<i64: 1>, scalar_prefetch = 0 : i64, scratch_operands = 0 : i64, tpu.core_type = #tpu.core_type<tc>, window_params = [{transform_indices = @transform_0, window_bounds = array<i64: 8, 8>}, {transform_indices = @transform_1, window_bounds = array<i64: 8, 4>}, {pipeline_mode = #tpu.pipeline_mode<synchronous>, transform_indices = @transform_2, window_bounds = array<i64: 8, 128>}, {pipeline_mode = #tpu.pipeline_mode<synchronous>, transform_indices = @transform_3, window_bounds = array<i64: 4, 128>}, {pipeline_mode = #tpu.pipeline_mode<synchronous>, transform_indices = @transform_4, window_bounds = array<i64: 1, 128>}, {pipeline_mode = #tpu.pipeline_mode<synchronous>, transform_indices = @transform_5, window_bounds = array<i64: 8, 64, 64>}, {pipeline_mode = #tpu.pipeline_mode<synchronous>, transform_indices = @transform_6, window_bounds = array<i64: 7, 1, 64>}, {pipeline_mode = #tpu.pipeline_mode<synchronous>, transform_indices = @transform_7, window_bounds = array<i64: 64, 128>}, {pipeline_mode = #tpu.pipeline_mode<synchronous>, transform_indices = @transform_8, window_bounds = array<i64: 1, 128>}, {transform_indices = @transform_9, window_bounds = array<i64: 8, 128>}]} {
    %c0 = arith.constant 0 : index
    %c0_0 = arith.constant 0 : index
    %0 = vector.load %arg1[%c0, %c0_0] : memref<8x8xf32, #tpu.memory_space<vmem>>, vector<8x8xf32>
    %c0_1 = arith.constant 0 : index
    %c0_2 = arith.constant 0 : index
    %1 = vector.load %arg3[%c0_1, %c0_2] : memref<8x128xf32, #tpu.memory_space<vmem>>, vector<8x128xf32>
    %cst = arith.constant dense<0.000000e+00> : vector<8x128xf32>
    %2 = tpu.matmul %0, %1, %cst {dimension_numbers = #tpu.dot_dimension_numbers<[1], [0], [0], [1], [0, 0, 1, 1], [], []>} : vector<8x8xf32>, vector<8x128xf32>, vector<8x128xf32> -> vector<8x128xf32>
    %c0_3 = arith.constant 0 : index
    %c0_4 = arith.constant 0 : index
    %3 = vector.load %arg2[%c0_3, %c0_4] : memref<8x4xf32, #tpu.memory_space<vmem>>, vector<8x4xf32>
    %c0_5 = arith.constant 0 : index
    %c0_6 = arith.constant 0 : index
    %4 = vector.load %arg4[%c0_5, %c0_6] : memref<4x128xf32, #tpu.memory_space<vmem>>, vector<4x128xf32>
    %cst_7 = arith.constant dense<0.000000e+00> : vector<8x128xf32>
    %5 = tpu.matmul %3, %4, %cst_7 {dimension_numbers = #tpu.dot_dimension_numbers<[1], [0], [0], [1], [0, 0, 1, 1], [], []>} : vector<8x4xf32>, vector<4x128xf32>, vector<8x128xf32> -> vector<8x128xf32>
    %6 = arith.addf %2, %5 : vector<8x128xf32>
    %c0_8 = arith.constant 0 : index
    %c0_9 = arith.constant 0 : index
    %7 = vector.load %arg5[%c0_8, %c0_9] : memref<1x128xf32, #tpu.memory_space<vmem>>, vector<1x128xf32>
    %8 = vector.broadcast %7 : vector<1x128xf32> to vector<8x128xf32>
    %9 = arith.addf %6, %8 : vector<8x128xf32>
    %10 = vector.extract_strided_slice %9 {offsets = [0, 0], sizes = [8, 64], strides = [1, 1]} : vector<8x128xf32> to vector<8x64xf32>
    %cst_10 = arith.constant 0.000000e+00 : f32
    %11 = vector.broadcast %cst_10 : f32 to vector<8x64xf32>
    %12 = arith.maximumf %10, %11 : vector<8x64xf32>
    %13 = arith.truncf %12 : vector<8x64xf32> to vector<8x64xbf16>
    %c0_11 = arith.constant 0 : index
    %c0_12 = arith.constant 0 : index
    %c0_13 = arith.constant 0 : index
    %14 = vector.load %arg6[%c0_11, %c0_12, %c0_13] : memref<8x64x64xbf16, #tpu.memory_space<vmem>>, vector<1x64x64xbf16>
    %15 = vector.shape_cast %14 : vector<1x64x64xbf16> to vector<64x64xbf16>
    %cst_14 = arith.constant dense<0.000000e+00> : vector<8x64xf32>
    %16 = tpu.matmul %13, %15, %cst_14 {dimension_numbers = #tpu.dot_dimension_numbers<[1], [0], [0], [1], [0, 0, 1, 1], [], []>} : vector<8x64xbf16>, vector<64x64xbf16>, vector<8x64xf32> -> vector<8x64xf32>
    %c0_15 = arith.constant 0 : index
    %c0_16 = arith.constant 0 : index
    %c0_17 = arith.constant 0 : index
    %17 = vector.load %arg7[%c0_15, %c0_16, %c0_17] : memref<7x1x64xf32, #tpu.memory_space<vmem>>, vector<1x1x64xf32>
    %18 = vector.shape_cast %17 : vector<1x1x64xf32> to vector<1x64xf32>
    %19 = vector.broadcast %18 : vector<1x64xf32> to vector<8x64xf32>
    %20 = arith.addf %16, %19 : vector<8x64xf32>
    %cst_18 = arith.constant 0.000000e+00 : f32
    %21 = vector.broadcast %cst_18 : f32 to vector<8x64xf32>
    %22 = arith.maximumf %20, %21 : vector<8x64xf32>
    %23 = arith.truncf %22 : vector<8x64xf32> to vector<8x64xbf16>
    %24 = vector.extract_strided_slice %9 {offsets = [0, 64], sizes = [8, 64], strides = [1, 1]} : vector<8x128xf32> to vector<8x64xf32>
    %c1 = arith.constant 1 : index
    %c0_19 = arith.constant 0 : index
    %c0_20 = arith.constant 0 : index
    %25 = vector.load %arg6[%c1, %c0_19, %c0_20] : memref<8x64x64xbf16, #tpu.memory_space<vmem>>, vector<1x64x64xbf16>
    %26 = vector.shape_cast %25 : vector<1x64x64xbf16> to vector<64x64xbf16>
    %cst_21 = arith.constant dense<0.000000e+00> : vector<8x64xf32>
    %27 = tpu.matmul %23, %26, %cst_21 {dimension_numbers = #tpu.dot_dimension_numbers<[1], [0], [0], [1], [0, 0, 1, 1], [], []>} : vector<8x64xbf16>, vector<64x64xbf16>, vector<8x64xf32> -> vector<8x64xf32>
    %28 = arith.addf %24, %27 : vector<8x64xf32>
    %cst_22 = arith.constant 0.000000e+00 : f32
    %29 = vector.broadcast %cst_22 : f32 to vector<8x64xf32>
    %30 = arith.maximumf %28, %29 : vector<8x64xf32>
    %31 = arith.truncf %30 : vector<8x64xf32> to vector<8x64xbf16>
    %c2 = arith.constant 2 : index
    %c0_23 = arith.constant 0 : index
    %c0_24 = arith.constant 0 : index
    %32 = vector.load %arg6[%c2, %c0_23, %c0_24] : memref<8x64x64xbf16, #tpu.memory_space<vmem>>, vector<1x64x64xbf16>
    %33 = vector.shape_cast %32 : vector<1x64x64xbf16> to vector<64x64xbf16>
    %cst_25 = arith.constant dense<0.000000e+00> : vector<8x64xf32>
    %34 = tpu.matmul %31, %33, %cst_25 {dimension_numbers = #tpu.dot_dimension_numbers<[1], [0], [0], [1], [0, 0, 1, 1], [], []>} : vector<8x64xbf16>, vector<64x64xbf16>, vector<8x64xf32> -> vector<8x64xf32>
    %c1_26 = arith.constant 1 : index
    %c0_27 = arith.constant 0 : index
    %c0_28 = arith.constant 0 : index
    %35 = vector.load %arg7[%c1_26, %c0_27, %c0_28] : memref<7x1x64xf32, #tpu.memory_space<vmem>>, vector<1x1x64xf32>
    %36 = vector.shape_cast %35 : vector<1x1x64xf32> to vector<1x64xf32>
    %37 = vector.broadcast %36 : vector<1x64xf32> to vector<8x64xf32>
    %38 = arith.addf %34, %37 : vector<8x64xf32>
    %cst_29 = arith.constant 0.000000e+00 : f32
    %39 = vector.broadcast %cst_29 : f32 to vector<8x64xf32>
    %40 = arith.maximumf %38, %39 : vector<8x64xf32>
    %41 = arith.truncf %40 : vector<8x64xf32> to vector<8x64xbf16>
    %c3 = arith.constant 3 : index
    %c0_30 = arith.constant 0 : index
    %c0_31 = arith.constant 0 : index
    %42 = vector.load %arg6[%c3, %c0_30, %c0_31] : memref<8x64x64xbf16, #tpu.memory_space<vmem>>, vector<1x64x64xbf16>
    %43 = vector.shape_cast %42 : vector<1x64x64xbf16> to vector<64x64xbf16>
    %cst_32 = arith.constant dense<0.000000e+00> : vector<8x64xf32>
    %44 = tpu.matmul %41, %43, %cst_32 {dimension_numbers = #tpu.dot_dimension_numbers<[1], [0], [0], [1], [0, 0, 1, 1], [], []>} : vector<8x64xbf16>, vector<64x64xbf16>, vector<8x64xf32> -> vector<8x64xf32>
    %c2_33 = arith.constant 2 : index
    %c0_34 = arith.constant 0 : index
    %c0_35 = arith.constant 0 : index
    %45 = vector.load %arg7[%c2_33, %c0_34, %c0_35] : memref<7x1x64xf32, #tpu.memory_space<vmem>>, vector<1x1x64xf32>
    %46 = vector.shape_cast %45 : vector<1x1x64xf32> to vector<1x64xf32>
    %47 = vector.broadcast %46 : vector<1x64xf32> to vector<8x64xf32>
    %48 = arith.addf %44, %47 : vector<8x64xf32>
    %cst_36 = arith.constant 0.000000e+00 : f32
    %49 = vector.broadcast %cst_36 : f32 to vector<8x64xf32>
    %50 = arith.maximumf %48, %49 : vector<8x64xf32>
    %51 = arith.truncf %50 : vector<8x64xf32> to vector<8x64xbf16>
    %c4 = arith.constant 4 : index
    %c0_37 = arith.constant 0 : index
    %c0_38 = arith.constant 0 : index
    %52 = vector.load %arg6[%c4, %c0_37, %c0_38] : memref<8x64x64xbf16, #tpu.memory_space<vmem>>, vector<1x64x64xbf16>
    %53 = vector.shape_cast %52 : vector<1x64x64xbf16> to vector<64x64xbf16>
    %cst_39 = arith.constant dense<0.000000e+00> : vector<8x64xf32>
    %54 = tpu.matmul %51, %53, %cst_39 {dimension_numbers = #tpu.dot_dimension_numbers<[1], [0], [0], [1], [0, 0, 1, 1], [], []>} : vector<8x64xbf16>, vector<64x64xbf16>, vector<8x64xf32> -> vector<8x64xf32>
    %c3_40 = arith.constant 3 : index
    %c0_41 = arith.constant 0 : index
    %c0_42 = arith.constant 0 : index
    %55 = vector.load %arg7[%c3_40, %c0_41, %c0_42] : memref<7x1x64xf32, #tpu.memory_space<vmem>>, vector<1x1x64xf32>
    %56 = vector.shape_cast %55 : vector<1x1x64xf32> to vector<1x64xf32>
    %57 = vector.broadcast %56 : vector<1x64xf32> to vector<8x64xf32>
    %58 = arith.addf %54, %57 : vector<8x64xf32>
    %59 = arith.addf %30, %58 : vector<8x64xf32>
    %60 = arith.truncf %59 : vector<8x64xf32> to vector<8x64xbf16>
    %c5 = arith.constant 5 : index
    %c0_43 = arith.constant 0 : index
    %c0_44 = arith.constant 0 : index
    %61 = vector.load %arg6[%c5, %c0_43, %c0_44] : memref<8x64x64xbf16, #tpu.memory_space<vmem>>, vector<1x64x64xbf16>
    %62 = vector.shape_cast %61 : vector<1x64x64xbf16> to vector<64x64xbf16>
    %cst_45 = arith.constant dense<0.000000e+00> : vector<8x64xf32>
    %63 = tpu.matmul %60, %62, %cst_45 {dimension_numbers = #tpu.dot_dimension_numbers<[1], [0], [0], [1], [0, 0, 1, 1], [], []>} : vector<8x64xbf16>, vector<64x64xbf16>, vector<8x64xf32> -> vector<8x64xf32>
    %c4_46 = arith.constant 4 : index
    %c0_47 = arith.constant 0 : index
    %c0_48 = arith.constant 0 : index
    %64 = vector.load %arg7[%c4_46, %c0_47, %c0_48] : memref<7x1x64xf32, #tpu.memory_space<vmem>>, vector<1x1x64xf32>
    %65 = vector.shape_cast %64 : vector<1x1x64xf32> to vector<1x64xf32>
    %66 = vector.broadcast %65 : vector<1x64xf32> to vector<8x64xf32>
    %67 = arith.addf %63, %66 : vector<8x64xf32>
    %cst_49 = arith.constant 0.000000e+00 : f32
    %68 = vector.broadcast %cst_49 : f32 to vector<8x64xf32>
    %69 = arith.maximumf %67, %68 : vector<8x64xf32>
    %70 = arith.truncf %69 : vector<8x64xf32> to vector<8x64xbf16>
    %c6 = arith.constant 6 : index
    %c0_50 = arith.constant 0 : index
    %c0_51 = arith.constant 0 : index
    %71 = vector.load %arg6[%c6, %c0_50, %c0_51] : memref<8x64x64xbf16, #tpu.memory_space<vmem>>, vector<1x64x64xbf16>
    %72 = vector.shape_cast %71 : vector<1x64x64xbf16> to vector<64x64xbf16>
    %cst_52 = arith.constant dense<0.000000e+00> : vector<8x64xf32>
    %73 = tpu.matmul %70, %72, %cst_52 {dimension_numbers = #tpu.dot_dimension_numbers<[1], [0], [0], [1], [0, 0, 1, 1], [], []>} : vector<8x64xbf16>, vector<64x64xbf16>, vector<8x64xf32> -> vector<8x64xf32>
    %c5_53 = arith.constant 5 : index
    %c0_54 = arith.constant 0 : index
    %c0_55 = arith.constant 0 : index
    %74 = vector.load %arg7[%c5_53, %c0_54, %c0_55] : memref<7x1x64xf32, #tpu.memory_space<vmem>>, vector<1x1x64xf32>
    %75 = vector.shape_cast %74 : vector<1x1x64xf32> to vector<1x64xf32>
    %76 = vector.broadcast %75 : vector<1x64xf32> to vector<8x64xf32>
    %77 = arith.addf %73, %76 : vector<8x64xf32>
    %cst_56 = arith.constant 0.000000e+00 : f32
    %78 = vector.broadcast %cst_56 : f32 to vector<8x64xf32>
    %79 = arith.maximumf %77, %78 : vector<8x64xf32>
    %80 = arith.truncf %79 : vector<8x64xf32> to vector<8x64xbf16>
    %c7 = arith.constant 7 : index
    %c0_57 = arith.constant 0 : index
    %c0_58 = arith.constant 0 : index
    %81 = vector.load %arg6[%c7, %c0_57, %c0_58] : memref<8x64x64xbf16, #tpu.memory_space<vmem>>, vector<1x64x64xbf16>
    %82 = vector.shape_cast %81 : vector<1x64x64xbf16> to vector<64x64xbf16>
    %cst_59 = arith.constant dense<0.000000e+00> : vector<8x64xf32>
    %83 = tpu.matmul %80, %82, %cst_59 {dimension_numbers = #tpu.dot_dimension_numbers<[1], [0], [0], [1], [0, 0, 1, 1], [], []>} : vector<8x64xbf16>, vector<64x64xbf16>, vector<8x64xf32> -> vector<8x64xf32>
    %c6_60 = arith.constant 6 : index
    %c0_61 = arith.constant 0 : index
    %c0_62 = arith.constant 0 : index
    %84 = vector.load %arg7[%c6_60, %c0_61, %c0_62] : memref<7x1x64xf32, #tpu.memory_space<vmem>>, vector<1x1x64xf32>
    %85 = vector.shape_cast %84 : vector<1x1x64xf32> to vector<1x64xf32>
    %86 = vector.broadcast %85 : vector<1x64xf32> to vector<8x64xf32>
    %87 = arith.addf %83, %86 : vector<8x64xf32>
    %88 = arith.addf %59, %87 : vector<8x64xf32>
    %89 = arith.truncf %88 : vector<8x64xf32> to vector<8x64xbf16>
    %c0_63 = arith.constant 0 : index
    %c0_64 = arith.constant 0 : index
    %90 = vector.load %arg8[%c0_63, %c0_64] : memref<64x128xbf16, #tpu.memory_space<vmem>>, vector<64x128xbf16>
    %cst_65 = arith.constant dense<0.000000e+00> : vector<8x128xf32>
    %91 = tpu.matmul %89, %90, %cst_65 {dimension_numbers = #tpu.dot_dimension_numbers<[1], [0], [0], [1], [0, 0, 1, 1], [], []>} : vector<8x64xbf16>, vector<64x128xbf16>, vector<8x128xf32> -> vector<8x128xf32>
    %c0_66 = arith.constant 0 : index
    %c0_67 = arith.constant 0 : index
    %92 = vector.load %arg9[%c0_66, %c0_67] : memref<1x128xf32, #tpu.memory_space<vmem>>, vector<1x128xf32>
    %93 = vector.broadcast %92 : vector<1x128xf32> to vector<8x128xf32>
    %94 = arith.addf %91, %93 : vector<8x128xf32>
    %95 = arith.truncf %94 : vector<8x128xf32> to vector<8x128xbf16>
    %c0_68 = arith.constant 0 : index
    %c0_69 = arith.constant 0 : index
    %96 = vector.load %arg10[%c0_68, %c0_69] : memref<8x128xbf16, #tpu.memory_space<vmem>>, vector<8x128xbf16>
    tpu.vector_store %arg10[%c0_68, %c0_69], %95 {strides = array<i32>} : memref<8x128xbf16, #tpu.memory_space<vmem>>, vector<8x128xbf16>,
    return
  }
  func.func @transform_0(%arg0: i32) -> (i32, i32) {
    %c0_i32 = arith.constant 0 : i32
    %c0_i32_0 = arith.constant 0 : i32
    return %arg0, %c0_i32 : i32, i32
  }
  func.func @transform_1(%arg0: i32) -> (i32, i32) {
    %c0_i32 = arith.constant 0 : i32
    %c0_i32_0 = arith.constant 0 : i32
    return %arg0, %c0_i32 : i32, i32
  }
  func.func @transform_2(%arg0: i32) -> (i32, i32) {
    %c0_i32 = arith.constant 0 : i32
    %c0_i32_0 = arith.constant 0 : i32
    %c0_i32_1 = arith.constant 0 : i32
    return %c0_i32, %c0_i32_0 : i32, i32
  }
  func.func @transform_3(%arg0: i32) -> (i32, i32) {
    %c0_i32 = arith.constant 0 : i32
    %c0_i32_0 = arith.constant 0 : i32
    %c0_i32_1 = arith.constant 0 : i32
    return %c0_i32, %c0_i32_0 : i32, i32
  }
  func.func @transform_4(%arg0: i32) -> (i32, i32) {
    %c0_i32 = arith.constant 0 : i32
    %c0_i32_0 = arith.constant 0 : i32
    %c0_i32_1 = arith.constant 0 : i32
    return %c0_i32, %c0_i32_0 : i32, i32
  }
  func.func @transform_5(%arg0: i32) -> (i32, i32, i32) {
    %c0_i32 = arith.constant 0 : i32
    %c0_i32_0 = arith.constant 0 : i32
    %c0_i32_1 = arith.constant 0 : i32
    %c0_i32_2 = arith.constant 0 : i32
    return %c0_i32, %c0_i32_0, %c0_i32_1 : i32, i32, i32
  }
  func.func @transform_6(%arg0: i32) -> (i32, i32, i32) {
    %c0_i32 = arith.constant 0 : i32
    %c0_i32_0 = arith.constant 0 : i32
    %c0_i32_1 = arith.constant 0 : i32
    %c0_i32_2 = arith.constant 0 : i32
    return %c0_i32, %c0_i32_0, %c0_i32_1 : i32, i32, i32
  }
  func.func @transform_7(%arg0: i32) -> (i32, i32) {
    %c0_i32 = arith.constant 0 : i32
    %c0_i32_0 = arith.constant 0 : i32
    %c0_i32_1 = arith.constant 0 : i32
    return %c0_i32, %c0_i32_0 : i32, i32
  }
  func.func @transform_8(%arg0: i32) -> (i32, i32) {
    %c0_i32 = arith.constant 0 : i32
    %c0_i32_0 = arith.constant 0 : i32
    %c0_i32_1 = arith.constant 0 : i32
    return %c0_i32, %c0_i32_0 : i32, i32
  }
  func.func @transform_9(%arg0: i32) -> (i32, i32) {
    %c0_i32 = arith.constant 0 : i32
    %c0_i32_0 = arith.constant 0 : i32
    return %arg0, %c0_i32 : i32, i32
  }
}

</mosaic_0001>

<bundles_post_ra>
// kernel: tpu_custom_call.1
= control target key start
LH: loop header
LB: loop body
LE: loop exit
PB: predicated region body
PF: predicated region fallthrough
CT: control target
= control target key end

     0   :  { %14 = vsyncpa [#allocation3], 0  ;;  %s1627_s0 = inlined_call_operand.vmem [shape: f32[8,8], index: 0, kind: input, shape index: {}]   ;;  %s1628_s1 = inlined_call_operand.vmem [shape: f32[8,4], index: 1, kind: input, shape index: {}]   ;;  %s1629_s2 = inlined_call_operand.hbm [shape: f32[8,128], index: 2, kind: input, shape index: {}]   ;;  %s1630_s3 = inlined_call_operand.hbm [shape: f32[4,128], index: 3, kind: input, shape index: {}]   ;;  %s1631_s4 = inlined_call_operand.vmem [shape: f32[1,128], index: 4, kind: input, shape index: {}]   ;;  %s1632_s5 = inlined_call_operand.hbm [shape: bf16[8,64,64], index: 5, kind: input, shape index: {}]   ;;  %s1633_s6 = inlined_call_operand.vmem [shape: f32[7,1,64], index: 6, kind: input, shape index: {}]   ;;  %s1634_s7 = inlined_call_operand.hbm [shape: bf16[64,128], index: 7, kind: input, shape index: {}]   ;;  %s1635_s8 = inlined_call_operand.vmem [shape: f32[1,128], index: 8, kind: input, shape index: {}]   ;;  %s1636_s9 = inlined_call_operand.hbm [shape: bf16[8,128], index: 9, kind: output, shape index: {}]  }
   0x1   :  { %15 = vsyncpa [#allocation6], 0 }
   0x2   :  { %16 = vsyncpa [#allocation9], 0 }
   0x3   :  { %17 = vsyncpa [#allocation4], 0  ;;  %s1436_s30 = smov [#allocation5]   ;;  %s1437_s11 = smov [#allocation2]  }
   0x4   :  { %s38_s10 = sshll.u32 %s1436_s30, 4  ;;  %s28_s12 = sshll.u32 %s1437_s11, 4  ;;  %s39_s10 = int_to_ptr.vmem [resolvable:$true] %s38_s10  ;;  %s29_s12 = int_to_ptr.vmem [resolvable:$true] %s28_s12 }
   0x5   :  { %s1336_s13 = scalar_lea.vmem %s39_s10, 64  ;;  %p1341_p1 = scmp.lt.s32.totalorder %s39_s10, %s39_s10 }
   0x6   :  { %p1337_p0 = scmp.ne.s32.totalorder %s39_s10, %s1336_s13  ;;  %p1342_p2 = scmp.lt.s32.totalorder %s1336_s13, %s1336_s13 }
   0x8   :  { %p1343_p3 = por %p1342_p2, %p1341_p1 }
   0xa   :  { %p1344_p4 = pnand %p1343_p3, %p1337_p0 }
   0xc   :  { %1347 = shalt.err (!%p1344_p4)
}
   0xd   :  { %41 = dma.hbm_to_vmem [thread:$0]  %s1630_s3, 64, %s39_s10, [#allocation6]  }
   0xe   :  { %s1356_s16 = scalar_lea.vmem %s29_s12, 128  ;;  %p1361_p6 = scmp.lt.s32.totalorder %s29_s12, %s29_s12 }
   0xf   :  { %p1357_p5 = scmp.ne.s32.totalorder %s29_s12, %s1356_s16  ;;  %p1362_p7 = scmp.lt.s32.totalorder %s1356_s16, %s1356_s16 }
  0x11   :  { %p1363_p8 = por %p1362_p7, %p1361_p6 }
  0x13   :  { %p1364_p9 = pnand %p1363_p8, %p1357_p5 }
  0x15   :  { %1367 = shalt.err (!%p1364_p9)
}
  0x16   :  { %31 = dma.hbm_to_vmem [thread:$0]  %s1629_s2, 128, %s29_s12, [#allocation3]  }
  0x17   :  { %s1438_s19 = smov [#allocation7]  }
  0x18   :  { %s49_s20 = sshll.u32 %s1438_s19, 4  ;;  %s50_s20 = int_to_ptr.vmem [resolvable:$true] %s49_s20 }
  0x19   :  { %s1376_s21 = scalar_lea.vmem %s50_s20, 4096  ;;  %p1381_p11 = scmp.lt.s32.totalorder %s50_s20, %s50_s20 }
  0x1a   :  { %p1377_p10 = scmp.ne.s32.totalorder %s50_s20, %s1376_s21  ;;  %p1382_p12 = scmp.lt.s32.totalorder %s1376_s21, %s1376_s21 }
  0x1c   :  { %p1383_p13 = por %p1382_p12, %p1381_p11 }
  0x1e   :  { %p1384_p0 = pnand %p1383_p13, %p1377_p10 }
  0x20   :  { %1387 = shalt.err (!%p1384_p0)
}
  0x21   :  { %s1439_s3 = smov 64   ;;  %s1440_s22 = smov 4  }
  0x22   :  { %55 = dma.hbm_to_vmem [thread:$0]  %s1632_s5, 4096, %s50_s20, [#allocation6], %s1439_s3, %s1439_s3, %s1440_s22  }
  0x23   :  { %s1441_s25 = smov [#allocation8]  }
  0x24   :  { %s63_s2 = sshll.u32 %s1441_s25, 4  ;;  %s64_s2 = int_to_ptr.vmem [resolvable:$true] %s63_s2 }
  0x25   :  { %s1396_s26 = scalar_lea.vmem %s64_s2, 512  ;;  %p1401_p2 = scmp.lt.s32.totalorder %s64_s2, %s64_s2 }
  0x26   :  { %p1397_p1 = scmp.ne.s32.totalorder %s64_s2, %s1396_s26  ;;  %p1402_p3 = scmp.lt.s32.totalorder %s1396_s26, %s1396_s26 }
  0x28   :  { %p1403_p4 = por %p1402_p3, %p1401_p2 }
  0x2a   :  { %p1404_p5 = pnand %p1403_p4, %p1397_p1 }
  0x2c   :  { %1407 = shalt.err (!%p1404_p5)
}
  0x2d   :  { %69 = dma.hbm_to_vmem [thread:$0]  %s1634_s7, 512, %s64_s2, [#allocation9], %s1439_s3, %s1439_s3, %s1440_s22  }
  0x2e   :  { %1428 = dma.done.wait [#allocation3], 128  }
  0x2f   :  { %1429 = vsyncadd [#allocation3], 4294967168 }
  0x30   :  { %1430 = dma.done.wait [#allocation6], 4160  }
  0x31   :  { %1431 = vsyncadd [#allocation6], 4294963136 }
  0x32   :  { %1432 = dma.done.wait [#allocation9], 512  }
  0x33   :  { %1433 = vsyncadd [#allocation9], 4294966784  ;;  %v1442_v0 = vmov 0.0   ;;  %vm1443_vm0 = vmmov 0   ;;  %vm93_vm1 = vcmask 1043456   ;;  %vm89_vm2 = vcmask 31744  }
  0x34   :  { %1165 = vmatprep.subr.mxu1 %v1442_v0  ;;  %1167 = vmatprep.mubr.msk.f32.mxu1 %vm1443_vm0, %v1442_v0  ;;  %v88_v1 = vld [vmem:[#allocation5] sm:$0xf]  ;;  %v87_v2 = vld [vmem:[%s1628_s1] sm:$0xff]  ;;  %vm167_vm3 = vcmask 64512   ;;  %v1294_v7 = vld [vmem:[#allocation7 + $0x8] sm:$0xff]   ;;  %vm290_vm4 = vcmask 523264  }
  0x35   :  { %1175 = vmatprep.subr.bf16.mxu0 %v1442_v0  ;;  %1183 = vmatprep.mubr.msk.bf16.mxu0 %vm1443_vm0, %v1442_v0  ;;  %v86_v3 = vld [vmem:[#allocation2] sm:$0xff]  ;;  %v1295_v8 = vld [vmem:[#allocation7] sm:$0xff]   ;;  %v1298_v20 = vld [vmem:[#allocation7 + $0x28] sm:$0xff]   ;;  %s1444_s24 = smov [#allocation10]  }
  0x36   :  { %1166 = vmatpush3.msk.msra.mxu1 %vm93_vm1, %v88_v1  ;;  %v85_v4 = vld [vmem:[%s1627_s0] sm:$0xff]  ;;  %v1299_v21 = vld [vmem:[#allocation7 + $0x20] sm:$0xff]   ;;  %v1302_v33 = vld [vmem:[#allocation7 + $0x48] sm:$0xff]   ;;  %s1042_s25 = sshll.u32 %s1444_s24, 4  ;;  %s1043_s25 = int_to_ptr.vmem [resolvable:$true] %s1042_s25 }
  0x37   :  { %1168 = vmatmul.mubr.msk.f32.vlgmr.msra.gmra.mxu1 %vm89_vm2, %v87_v2  ;;  %1170 = vmatprep.subr.mxu1 %v1442_v0  ;;  %v1292_v5 = vld [vmem:[#allocation7 + $0x18] sm:$0xff]   ;;  %v1293_v6 = vld [vmem:[#allocation7 + $0x10] sm:$0xff]   ;;  %v1303_v36 = vld [vmem:[#allocation7 + $0x40] sm:$0xff]   ;;  %s1408_s2 = scalar_lea.vmem %s1043_s25, 64  ;;  %p1413_p7 = scmp.lt.s32.totalorder %s1043_s25, %s1043_s25 }
  0x38   :  { %1171 = vmatpush3.msra.mxu1 %v86_v3  ;;  %1172 = vmatprep.mubr.msk.f32.mxu1 %vm1443_vm0, %v1442_v0  ;;  %v1296_v9 = vld [vmem:[#allocation7 + $0x38] sm:$0xff]   ;;  %v1297_v10 = vld [vmem:[#allocation7 + $0x30] sm:$0xff]   ;;  %v1306_v45 = vld [vmem:[#allocation7 + $0x68] sm:$0xff]   ;;  %p1409_p6 = scmp.ne.s32.totalorder %s1043_s25, %s1408_s2  ;;  %p1414_p8 = scmp.lt.s32.totalorder %s1408_s2, %s1408_s2 }
  0x39   :  { %1176 = vmatpush3.bf16.msra.mxu0 %v1292_v5  ;;  %1187 = vmatprep.subr.bf16.mxu1 %v1442_v0  ;;  %v1056_v14 = vld [vmem:[%s1631_s4] ss:$0 sm:$0xff]  ;;  %v1300_v30 = vld [vmem:[#allocation7 + $0x58] sm:$0xff]   ;;  %v1307_v46 = vld [vmem:[#allocation7 + $0x60] sm:$0xff]  }
  0x3a   :  { %1177 = vmatprep.subr.bf16.mxu0 %v1442_v0  ;;  %v1057_v22 = vld [vmem:[%s1633_s6] ss:$0 sm:$0xff]  ;;  %v1304_v38 = vld [vmem:[#allocation7 + $0x78] sm:$0xff]   ;;  %v1069_v49 = vld [vmem:[%s1633_s6 + $0x1] ss:$0 sm:$0xff]  ;;  %p1415_p9 = por %p1414_p8, %p1413_p7 }
  0x3b   :  { %1173 = vmatmul.mubr.msk.f32.vlgmr.msra.gmra.mxu1 %vm167_vm3, %v85_v4  ;;  %v1301_v31 = vld [vmem:[#allocation7 + $0x50] sm:$0xff]   ;;  %v1308_v47 = vld [vmem:[#allocation7 + $0x98] sm:$0xff]   ;;  %v1310_v57 = vld [vmem:[#allocation7 + $0x88] sm:$0xff]  }
  0x3c   :  { %1195 = vmatprep.mubr.msk.bf16.mxu1 %vm1443_vm0, %v1442_v0  ;;  %1188 = vmatpush3.bf16.msra.mxu1 %v1296_v9  ;;  %v1305_v39 = vld [vmem:[#allocation7 + $0x70] sm:$0xff]   ;;  %v1311_v58 = vld [vmem:[#allocation7 + $0x80] sm:$0xff]   ;;  %v1312_v4 = vld [vmem:[#allocation7 + $0xb8] sm:$0xff]   ;;  %p1416_p10 = pnand %p1415_p9, %p1409_p6 }
  0x3d   :  { %1178 = vmatpush3.bf16.msra.mxu0 %v1293_v6  ;;  %1189 = vmatprep.subr.bf16.mxu1 %v1442_v0  ;;  %v1309_v48 = vld [vmem:[#allocation7 + $0x90] sm:$0xff]  }
  0x3e   :  { %1179 = vmatprep.subr.bf16.mxu0 %v1442_v0  ;;  %v1076_v59 = vld [vmem:[%s1633_s6 + $0x2] ss:$0 sm:$0xff]  ;;  %v1083_v6 = vld [vmem:[%s1633_s6 + $0x3] ss:$0 sm:$0xff] }
  0x3f   :  { %v1313_v5 = vld [vmem:[#allocation7 + $0xb0] sm:$0xff]  }
  0x40   :  { %1190 = vmatpush3.bf16.msra.mxu1 %v1297_v10 }
  0x41   :  { %1180 = vmatpush3.bf16.msra.mxu0 %v1294_v7  ;;  %1191 = vmatprep.subr.bf16.mxu1 %v1442_v0 }
  0x42   :  { %1181 = vmatprep.subr.bf16.mxu0 %v1442_v0 }
  0x44   :  { %1192 = vmatpush3.bf16.msra.mxu1 %v1298_v20  ;;  %v1318_v20 = vld [vmem:[#allocation7 + $0xc8] sm:$0xff]  }
  0x45   :  { %1182 = vmatpush3.bf16.msra.mxu0 %v1295_v8  ;;  %1193 = vmatprep.subr.bf16.mxu1 %v1442_v0  ;;  %v1314_v8 = vld [vmem:[#allocation7 + $0xa8] sm:$0xff]  }
  0x46   :  { %1199 = vmatprep.subr.bf16.mxu0 %v1442_v0 }
  0x48   :  { %1194 = vmatpush3.bf16.msra.mxu1 %v1299_v21  ;;  %v1319_v21 = vld [vmem:[#allocation7 + $0xc0] sm:$0xff]  }
  0x49   :  { %1211 = vmatprep.subr.bf16.mxu1 %v1442_v0 }
  0xf7   :  { %v163_v11 = vpop.f32.mrf.mxu1 }
  0xf9   :  { %v1169_v12 = vpop.f32.mrf.mxu1 }
  0xfa   :  { %v1315_v12 = vld [vmem:[#allocation7 + $0xa0] sm:$0xff]  }
  0xfb   :  { %v237_v13 = vpop.f32.mrf.mxu1 }
  0xfc   :  { %v238_v15 = vadd.f32 %v237_v13, %v163_v11 }
  0xfd   :  { %v1174_v16 = vpop.f32.mrf.mxu1 }
  0xfe   :  { %v248_v17 = vadd.f32 %v1056_v14, %v238_v15  ;;  %v1316_v14 = vld [vmem:[#allocation7 + $0xd8] sm:$0xff]   ;;  %v1317_v15 = vld [vmem:[#allocation7 + $0xd0] sm:$0xff]  }
 0x100   :  { %v249_v18 = vmax.f32 %v248_v17, 0.0 }
 0x102   :  { %v250_v19 = vpack.c.bf16 %v249_v18, %v249_v18 }
 0x104   :  { %1184 = vmatmul.mubr.msk.bf16.vlgmr.msra.gmra.mxu0 %vm290_vm4, %v250_v19 }
 0x105   :  { %1207 = vmatprep.mubr.msk.bf16.mxu0 %vm1443_vm0, %v1442_v0  ;;  %1200 = vmatpush3.bf16.msra.mxu0 %v1300_v30 }
 0x106   :  { %1201 = vmatprep.subr.bf16.mxu0 %v1442_v0 }
 0x109   :  { %1202 = vmatpush3.bf16.msra.mxu0 %v1301_v31 }
 0x10a   :  { %1203 = vmatprep.subr.bf16.mxu0 %v1442_v0 }
 0x10d   :  { %1204 = vmatpush3.bf16.msra.mxu0 %v1302_v33  ;;  %v1323_v33 = vld [vmem:[#allocation7 + $0xe0] sm:$0xff]  }
 0x10e   :  { %1205 = vmatprep.subr.bf16.mxu0 %v1442_v0 }
 0x111   :  { %1206 = vmatpush3.bf16.msra.mxu0 %v1303_v36 }
 0x112   :  { %1223 = vmatprep.subr.bf16.mxu0 %v1442_v0 }
 0x1c4   :  { %v328_v23 = vpop.f32.mrf.mxu0 }
 0x1c5   :  { %v329_v24 = vadd.f32 %v1057_v22, %v328_v23  ;;  %v1320_v22 = vld [vmem:[#allocation7 + $0xf8] sm:$0xff]   ;;  %v1321_v23 = vld [vmem:[#allocation7 + $0xf0] sm:$0xff]  }
 0x1c6   :  { %v1185_v25 = vpop.f32.mrf.mxu0 }
 0x1c7   :  { %v334_v26 = vmax.f32 %v329_v24, 0.0  ;;  %v1090_v24 = vld [vmem:[%s1633_s6 + $0x4] ss:$0 sm:$0xff] }
 0x1c8   :  { %v331_v27 = vpop.f32.mrf.mxu0 }
 0x1c9   :  { %v335_v28 = vpack.c.bf16 %v334_v26, %v334_v26 }
 0x1ca   :  { %v1186_v29 = vpop.f32.mrf.mxu0 }
 0x1cb   :  { %1196 = vmatmul.mubr.msk.bf16.vlgmr.msra.gmra.mxu1 %vm290_vm4, %v335_v28 }
 0x1cc   :  { %1219 = vmatprep.mubr.msk.bf16.mxu1 %vm1443_vm0, %v1442_v0  ;;  %1212 = vmatpush3.bf16.msra.mxu1 %v1304_v38 }
 0x1cd   :  { %1213 = vmatprep.subr.bf16.mxu1 %v1442_v0 }
 0x1d0   :  { %1214 = vmatpush3.bf16.msra.mxu1 %v1305_v39 }
 0x1d1   :  { %1215 = vmatprep.subr.bf16.mxu1 %v1442_v0 }
 0x1d4   :  { %1216 = vmatpush3.bf16.msra.mxu1 %v1306_v45 }
 0x1d5   :  { %1217 = vmatprep.subr.bf16.mxu1 %v1442_v0 }
 0x1d8   :  { %1218 = vmatpush3.bf16.msra.mxu1 %v1307_v46  ;;  %v1326_v46 = vld [vmem:[#allocation8 + $0x8] sm:$0xff]  }
 0x1d9   :  { %1235 = vmatprep.subr.bf16.mxu1 %v1442_v0 }
 0x28b   :  { %v406_v32 = vpop.f32.mrf.mxu1 }
 0x28c   :  { %413 = vrot.lane.b32.xlu0 %v406_v32, %s1439_s3  ;;  %v1322_v32 = vld [vmem:[#allocation7 + $0xe8] sm:$0xff]  }
 0x28d   :  { %v1197_v34 = vpop.f32.mrf.mxu1 }
 0x28e   :  { %v1097_v34 = vld [vmem:[%s1633_s6 + $0x5] ss:$0 sm:$0xff] }
 0x28f   :  { %v409_v35 = vpop.f32.mrf.mxu1 }
 0x291   :  { %v1198_v37 = vpop.f32.mrf.mxu1 }
 0x2fe   :  { %v414_v40 = vpop.permute.xlu0 %413 }
 0x2ff   :  { %v416_v41 = vadd.f32 %v414_v40, %v248_v17 }
 0x301   :  { %v1556_v42 = vmax.f32 %v416_v41, 0.0 }
 0x303   :  { %v418_v43 = vpack.c.bf16 %v1556_v42, %v1556_v42 }
 0x305   :  { %437 = vrot.lane.b32.xlu0 %v418_v43, %s1439_s3  ;;  %v1325_v43 = vld [vmem:[#allocation8 + $0x10] sm:$0xff]  }
 0x377   :  { %v438_v44 = vpop.permute.xlu0 %437 }
 0x378   :  { %1208 = vmatmul.mubr.msk.bf16.vlgmr.msra.gmra.mxu0 %vm290_vm4, %v438_v44  ;;  %v1104_v44 = vld [vmem:[%s1633_s6 + $0x6] ss:$0 sm:$0xff] }
 0x379   :  { %1231 = vmatprep.mubr.msk.bf16.mxu0 %vm1443_vm0, %v1442_v0  ;;  %1224 = vmatpush3.bf16.msra.mxu0 %v1308_v47 }
 0x37a   :  { %1225 = vmatprep.subr.bf16.mxu0 %v1442_v0 }
 0x37d   :  { %1226 = vmatpush3.bf16.msra.mxu0 %v1309_v48 }
 0x37e   :  { %1227 = vmatprep.subr.bf16.mxu0 %v1442_v0 }
 0x381   :  { %1228 = vmatpush3.bf16.msra.mxu0 %v1310_v57 }
 0x382   :  { %1229 = vmatprep.subr.bf16.mxu0 %v1442_v0 }
 0x385   :  { %1230 = vmatpush3.bf16.msra.mxu0 %v1311_v58 }
 0x386   :  { %1247 = vmatprep.subr.bf16.mxu0 %v1442_v0 }
 0x438   :  { %v500_v50 = vpop.f32.mrf.mxu0 }
 0x439   :  { %v501_v51 = vadd.f32 %v1069_v49, %v500_v50  ;;  %v1327_v50 = vld [vmem:[#allocation8] sm:$0xff]  }
 0x43a   :  { %v1209_v52 = vpop.f32.mrf.mxu0 }
 0x43b   :  { %v506_v53 = vmax.f32 %v501_v51, 0.0 }
 0x43c   :  { %v503_v54 = vpop.f32.mrf.mxu0 }
 0x43d   :  { %v507_v55 = vpack.c.bf16 %v506_v53, %v506_v53 }
 0x43e   :  { %v1210_v56 = vpop.f32.mrf.mxu0 }
 0x43f   :  { %1220 = vmatmul.mubr.msk.bf16.vlgmr.msra.gmra.mxu1 %vm290_vm4, %v507_v55  ;;  %v1110_v56 = vld [vmem:[%s1635_s8] ss:$0 sm:$0xff] }
 0x440   :  { %1243 = vmatprep.mubr.msk.bf16.mxu1 %vm1443_vm0, %v1442_v0  ;;  %1236 = vmatpush3.bf16.msra.mxu1 %v1312_v4 }
 0x441   :  { %1237 = vmatprep.subr.bf16.mxu1 %v1442_v0 }
 0x444   :  { %1238 = vmatpush3.bf16.msra.mxu1 %v1313_v5 }
 0x445   :  { %1239 = vmatprep.subr.bf16.mxu1 %v1442_v0 }
 0x448   :  { %1240 = vmatpush3.bf16.msra.mxu1 %v1314_v8 }
 0x449   :  { %1241 = vmatprep.subr.bf16.mxu1 %v1442_v0 }
 0x44c   :  { %1242 = vmatpush3.bf16.msra.mxu1 %v1315_v12 }
 0x44d   :  { %1259 = vmatprep.subr.bf16.mxu1 %v1442_v0 }
 0x4ff   :  { %v586_v60 = vpop.f32.mrf.mxu1 }
 0x500   :  { %v587_v61 = vadd.f32 %v1076_v59, %v586_v60 }
 0x501   :  { %v1221_v62 = vpop.f32.mrf.mxu1 }
 0x502   :  { %v592_v63 = vmax.f32 %v587_v61, 0.0 }
 0x503   :  { %v589_v1 = vpop.f32.mrf.mxu1 }
 0x504   :  { %v593_v2 = vpack.c.bf16 %v592_v63, %v592_v63 }
 0x505   :  { %v1222_v3 = vpop.f32.mrf.mxu1 }
 0x506   :  { %1232 = vmatmul.mubr.msk.bf16.vlgmr.msra.gmra.mxu0 %vm290_vm4, %v593_v2 }
 0x507   :  { %1255 = vmatprep.mubr.msk.bf16.mxu0 %vm1443_vm0, %v1442_v0  ;;  %1248 = vmatpush3.bf16.msra.mxu0 %v1316_v14 }
 0x508   :  { %1249 = vmatprep.subr.bf16.mxu0 %v1442_v0 }
 0x50b   :  { %1250 = vmatpush3.bf16.msra.mxu0 %v1317_v15 }
 0x50c   :  { %1251 = vmatprep.subr.bf16.mxu0 %v1442_v0 }
 0x50f   :  { %1252 = vmatpush3.bf16.msra.mxu0 %v1318_v20 }
 0x510   :  { %1253 = vmatprep.subr.bf16.mxu0 %v1442_v0 }
 0x513   :  { %1254 = vmatpush3.bf16.msra.mxu0 %v1319_v21 }
 0x514   :  { %1271 = vmatprep.subr.bf16.mxu0 %v1442_v0 }
 0x5c6   :  { %v672_v7 = vpop.f32.mrf.mxu0 }
 0x5c7   :  { %v673_v9 = vadd.f32 %v1083_v6, %v672_v7 }
 0x5c8   :  { %v1233_v10 = vpop.f32.mrf.mxu0 }
 0x5c9   :  { %679 = vrot.lane.b32.xlu1 %v673_v9, %s1439_s3 }
 0x5ca   :  { %v675_v11 = vpop.f32.mrf.mxu0 }
 0x5cc   :  { %v1234_v13 = vpop.f32.mrf.mxu0 }
 0x63b   :  { %v680_v16 = vpop.permute.xlu1 %679 }
 0x63c   :  { %v682_v17 = vadd.f32 %v680_v16, %v1556_v42  ;;  %v1324_v42 = vld [vmem:[#allocation8 + $0x18] sm:$0xff]  }
 0x63e   :  { %v683_v18 = vpack.c.bf16 %v682_v17, %v682_v17 }
 0x640   :  { %702 = vrot.lane.b32.xlu1 %v683_v18, %s1439_s3 }
 0x6b2   :  { %v703_v19 = vpop.permute.xlu1 %702 }
 0x6b3   :  { %1244 = vmatmul.mubr.msk.bf16.vlgmr.msra.gmra.mxu1 %vm290_vm4, %v703_v19 }
 0x6b4   :  { %1267 = vmatprep.mubr.msk.bf16.mxu1 %vm1443_vm0, %v1442_v0  ;;  %1260 = vmatpush3.bf16.msra.mxu1 %v1320_v22 }
 0x6b5   :  { %1261 = vmatprep.subr.bf16.mxu1 %v1442_v0 }
 0x6b8   :  { %1262 = vmatpush3.bf16.msra.mxu1 %v1321_v23 }
 0x6b9   :  { %1263 = vmatprep.subr.bf16.mxu1 %v1442_v0 }
 0x6bc   :  { %1264 = vmatpush3.bf16.msra.mxu1 %v1322_v32 }
 0x6bd   :  { %1265 = vmatprep.subr.bf16.mxu1 %v1442_v0 }
 0x6c0   :  { %1266 = vmatpush3.bf16.msra.mxu1 %v1323_v33 }
 0x773   :  { %v765_v25 = vpop.f32.mrf.mxu1 }
 0x774   :  { %v766_v26 = vadd.f32 %v1090_v24, %v765_v25 }
 0x775   :  { %v1245_v27 = vpop.f32.mrf.mxu1 }
 0x776   :  { %v771_v28 = vmax.f32 %v766_v26, 0.0 }
 0x777   :  { %v768_v29 = vpop.f32.mrf.mxu1 }
 0x778   :  { %v772_v30 = vpack.c.bf16 %v771_v28, %v771_v28 }
 0x779   :  { %v1246_v31 = vpop.f32.mrf.mxu1 }
 0x77a   :  { %1256 = vmatmul.mubr.msk.bf16.vlgmr.msra.gmra.mxu0 %vm290_vm4, %v772_v30 }
 0x77b   :  { %1279 = vmatprep.mubr.msk.bf16.mxu0 %vm1443_vm0, %v1442_v0  ;;  %1272 = vmatpush3.bf16.msra.mxu0 %v1324_v42 }
 0x77c   :  { %1273 = vmatprep.subr.bf16.mxu0 %v1442_v0 }
 0x77f   :  { %1274 = vmatpush3.bf16.msra.mxu0 %v1325_v43 }
 0x780   :  { %1275 = vmatprep.subr.bf16.mxu0 %v1442_v0 }
 0x783   :  { %1276 = vmatpush3.bf16.msra.mxu0 %v1326_v46 }
 0x784   :  { %1277 = vmatprep.subr.bf16.mxu0 %v1442_v0 }
 0x787   :  { %1278 = vmatpush3.bf16.msra.mxu0 %v1327_v50 }
 0x83a   :  { %v851_v35 = vpop.f32.mrf.mxu0 }
 0x83b   :  { %v852_v36 = vadd.f32 %v1097_v34, %v851_v35 }
 0x83c   :  { %v1257_v37 = vpop.f32.mrf.mxu0 }
 0x83d   :  { %v857_v38 = vmax.f32 %v852_v36, 0.0 }
 0x83e   :  { %v854_v39 = vpop.f32.mrf.mxu0 }
 0x83f   :  { %v858_v40 = vpack.c.bf16 %v857_v38, %v857_v38 }
 0x840   :  { %v1258_v41 = vpop.f32.mrf.mxu0 }
 0x841   :  { %1268 = vmatmul.mubr.msk.bf16.vlgmr.msra.gmra.mxu1 %vm290_vm4, %v858_v40 }
 0x901   :  { %v937_v45 = vpop.f32.mrf.mxu1 }
 0x902   :  { %v938_v47 = vadd.f32 %v1104_v44, %v937_v45 }
 0x903   :  { %v1269_v48 = vpop.f32.mrf.mxu1 }
 0x904   :  { %944 = vrot.lane.b32.xlu0 %v938_v47, %s1439_s3 }
 0x905   :  { %v940_v49 = vpop.f32.mrf.mxu1 }
 0x907   :  { %v1270_v51 = vpop.f32.mrf.mxu1 }
 0x976   :  { %v945_v52 = vpop.permute.xlu0 %944 }
 0x977   :  { %v947_v53 = vadd.f32 %v945_v52, %v682_v17 }
 0x979   :  { %v948_v54 = vpack.c.bf16 %v947_v53, %v947_v53 }
 0x97b   :  { %965 = vrot.lane.b32.xlu1 %v948_v54, %s1439_s3 }
 0x9ed   :  { %v966_v55 = vpop.permute.xlu1 %965 }
 0x9ee   :  { %1280 = vmatmul.mubr.msk.bf16.vlgmr.msra.gmra.mxu0 %vm290_vm4, %v966_v55 }
 0xaae   :  { %v1028_v57 = vpop.f32.mrf.mxu0 }
 0xaaf   :  { %v1029_v58 = vadd.f32 %v1110_v56, %v1028_v57 }
 0xab0   :  { %v1281_v59 = vpop.f32.mrf.mxu0 }
 0xab1   :  { %v1034_v0 = vpack.c.bf16 %v1029_v58, %v1029_v58 }
 0xab2   :  { %v1031_v60 = vpop.f32.mrf.mxu0 }
 0xab3   :  { %1035 = vst [vmem:[#allocation10] sm:$0xf] %v1034_v0 }
 0xab4   :  { %v1282_v61 = vpop.f32.mrf.mxu0 }
 0xab5   :  { %1419 = shalt.err (!%p1416_p10)
}
 0xab6   :  { %1045 = dma.vmem_to_hbm [thread:$0]  %s1043_s25, 64, %s1636_s9, [#allocation4]  }
 0xab7   :  { %1434 = dma.done.wait [#allocation4], 64  }
 0xab8   :  { %1435 = vsyncadd [#allocation4], 4294967232 }
 0xab9   :  { %1049 = vsyncpa [#allocation3], 1 }
 0xaba   :  { %1050 = vsyncpa [#allocation6], 1 }
 0xabb   :  { %1051 = vsyncpa [#allocation9], 1 }
 0xabc   :  { %1052 = vsyncpa [#allocation4], 1 }

</bundles_post_ra>
